<compile_context>
chip_gen: v6e
topology: v6e:2x2x1
jax: 0.10.0
libtpu: 0.0.40
codegen_flags: <defaults>
</compile_context>

<pallas_src>
import jax
import jax.numpy as jnp
from jax.experimental import pallas as pl
from jax.experimental.pallas import tpu as pltpu

IN_DIM = 32 * 32 * 3   # 3072  (already a multiple of 128)
H1 = 100
H2 = 100
OUT = 10

# Lane-padded sizes (multiples of 128 for full MXU tiles / unmasked stores)
H_PAD = 128
OUT_PAD = 128

_SUBLANE = 8           # f32 sublane tile (x and the output stay f32 in HBM)


def _choose_tile_b(B):
    """Rows per grid step: minimal sublane-aligned tile for tiny batches, up to
    256 rows for big ones, always leaving >= 2 grid steps once B > 128 so the
    'parallel' axis can shard across both v7x TensorCores."""
    if B <= 128:
        return -(-B // _SUBLANE) * _SUBLANE
    half = -(-B // 2)
    return min(256, -(-half // _SUBLANE) * _SUBLANE)


def mlp_kernel(x_ref, w1_ref, b1_ref, w2_ref, b2_ref, w3_ref, b3_ref, o_ref):
    # x: (TILE_B, IN_DIM) f32 (DMA'd once, cast in VMEM); weights bf16
    # (zero-padded to 128 lanes); biases f32 (zero-padded).
    x = x_ref[...].astype(jnp.bfloat16)

    # fc1 + ReLU  (bf16 MXU feed, f32 accumulate)
    h1 = jnp.dot(x, w1_ref[...], preferred_element_type=jnp.float32) + b1_ref[...]
    h1 = jnp.maximum(h1, 0.0)
    # fc1_drop: Dropout(p=0.2) is identity in eval/inference mode.
    # TODO(synk): training-mode dropout (pltpu.prng_seed + prng_random_bits mask) not emitted.

    # fc2 + ReLU
    h2 = jnp.dot(h1.astype(jnp.bfloat16), w2_ref[...],
                 preferred_element_type=jnp.float32) + b2_ref[...]
    h2 = jnp.maximum(h2, 0.0)
    # fc2_drop: identity in eval mode.

    # fc3 (padded to 128 output lanes; padded columns are exactly 0)
    logits = jnp.dot(h2.astype(jnp.bfloat16), w3_ref[...],
                     preferred_element_type=jnp.float32) + b3_ref[...]

    # Numerically stable log_softmax over the 10 real columns.
    # Padded logits are exactly 0, so the row max (>= 0) is still an upper
    # bound of the real logits; mask only inside the exp-sum.
    m = jnp.max(logits, axis=-1, keepdims=True)
    shifted = logits - m
    col = jax.lax.broadcasted_iota(jnp.int32, shifted.shape, 1)
    exps = jnp.where(col < OUT, jnp.exp(shifted), 0.0)
    lse = jnp.log(jnp.sum(exps, axis=-1, keepdims=True))
    o_ref[...] = (shifted - lse).astype(o_ref.dtype)


def net_forward(x_nchw, params):
    """x_nchw: (B, 3, 32, 32) f32.  Returns (B, 10) f32 log-probabilities."""
    w1, b1, w2, b2, w3, b3 = params     # lane-padded; weights bf16, biases f32
    B = x_nchw.shape[0]

    # Flatten exactly like x.view(-1, 32*32*3) on an NCHW tensor (free reshape).
    x = x_nchw.reshape(B, IN_DIM)

    tile_b = _choose_tile_b(B)
    B_pad = pl.cdiv(B, tile_b) * tile_b
    if B_pad != B:
        x = jnp.pad(x, ((0, B_pad - B), (0, 0)))

    grid = (B_pad // tile_b,)

    # Weights/biases stay resident in VMEM across grid steps (block index fixed at (0,0)).
    resident = lambda shape: pl.BlockSpec(shape, lambda i: (0, 0))

    out_padded = pl.pallas_call(
        mlp_kernel,
        out_shape=jax.ShapeDtypeStruct((B_pad, OUT_PAD), jnp.float32),
        grid=grid,
        in_specs=[
            pl.BlockSpec((tile_b, IN_DIM), lambda i: (i, 0)),   # x: tiled over batch
            resident((IN_DIM, H_PAD)), resident((1, H_PAD)),    # fc1
            resident((H_PAD, H_PAD)),  resident((1, H_PAD)),    # fc2
            resident((H_PAD, OUT_PAD)), resident((1, OUT_PAD)), # fc3
        ],
        out_specs=pl.BlockSpec((tile_b, OUT_PAD), lambda i: (i, 0)),
        compiler_params=pltpu.CompilerParams(
            dimension_semantics=("parallel",)),
    )(x, w1, b1, w2, b2, w3, b3)

    # Strip batch + lane padding.
    return out_padded[:B, :OUT]


def init_params(key):
    """nn.Linear-style init (U[-1/sqrt(fan_in), 1/sqrt(fan_in)]), zero-padded to
    128-lane shapes; weights cast to bfloat16, biases kept f32."""
    ks = jax.random.split(key, 6)

    def linear(kw, kb, fan_in, fan_out, fan_in_pad, fan_out_pad):
        bound = 1.0 / jnp.sqrt(jnp.float32(fan_in))
        w = jax.random.uniform(kw, (fan_in, fan_out), jnp.float32, -bound, bound)
        b = jax.random.uniform(kb, (1, fan_out), jnp.float32, -bound, bound)
        w = jnp.pad(w, ((0, fan_in_pad - fan_in), (0, fan_out_pad - fan_out)))
        b = jnp.pad(b, ((0, 0), (0, fan_out_pad - fan_out)))
        return w.astype(jnp.bfloat16), b

    w1, b1 = linear(ks[0], ks[1], IN_DIM, H1, IN_DIM, H_PAD)
    w2, b2 = linear(ks[2], ks[3], H1, H2, H_PAD, H_PAD)
    w3, b3 = linear(ks[4], ks[5], H2, OUT, H_PAD, OUT_PAD)
    return (w1, b1, w2, b2, w3, b3)


if __name__ == "__main__":
    key = jax.random.PRNGKey(0)
    k_param, k_x = jax.random.split(key)

    params = init_params(k_param)
    # Small input consistent with the module: batch=8, CIFAR-like NCHW (8, 3, 32, 32)
    x = jax.random.normal(k_x, (8, 3, 32, 32), jnp.float32)

    out = net_forward(x, params)
    out = jax.block_until_ready(out)

    assert out.shape == (8, OUT)
    # rows of log_softmax must (numerically) exponentiate-and-sum to 1
    row_sums = jnp.exp(out.astype(jnp.float32)).sum(axis=-1)
    assert bool(jnp.all(jnp.abs(row_sums - 1.0) < 1e-3))
    assert bool(jnp.all(jnp.isfinite(out)))

    print("KERNEL_OK")
</pallas_src>

<mosaic_0001>
module attributes {stable_mosaic.version = 11 : i64} {
  func.func @mlp_kernel(%arg0: i32, %arg1: memref<8x3072xf32, #tpu.memory_space<vmem>>, %arg2: memref<3072x128xbf16, #tpu.memory_space<vmem>>, %arg3: memref<1x128xf32, #tpu.memory_space<vmem>>, %arg4: memref<128x128xbf16, #tpu.memory_space<vmem>>, %arg5: memref<1x128xf32, #tpu.memory_space<vmem>>, %arg6: memref<128x128xbf16, #tpu.memory_space<vmem>>, %arg7: memref<1x128xf32, #tpu.memory_space<vmem>>, %arg8: memref<8x128xf32, #tpu.memory_space<vmem>>) attributes {dimension_semantics = [#tpu.dimension_semantics<parallel>], iteration_bounds = array<i64: 1>, scalar_prefetch = 0 : i64, scratch_operands = 0 : i64, tpu.core_type = #tpu.core_type<tc>, window_params = [{transform_indices = @transform_0, window_bounds = array<i64: 8, 3072>}, {pipeline_mode = #tpu.pipeline_mode<synchronous>, transform_indices = @transform_1, window_bounds = array<i64: 3072, 128>}, {pipeline_mode = #tpu.pipeline_mode<synchronous>, transform_indices = @transform_2, window_bounds = array<i64: 1, 128>}, {pipeline_mode = #tpu.pipeline_mode<synchronous>, transform_indices = @transform_3, window_bounds = array<i64: 128, 128>}, {pipeline_mode = #tpu.pipeline_mode<synchronous>, transform_indices = @transform_4, window_bounds = array<i64: 1, 128>}, {pipeline_mode = #tpu.pipeline_mode<synchronous>, transform_indices = @transform_5, window_bounds = array<i64: 128, 128>}, {pipeline_mode = #tpu.pipeline_mode<synchronous>, transform_indices = @transform_6, window_bounds = array<i64: 1, 128>}, {transform_indices = @transform_7, window_bounds = array<i64: 8, 128>}]} {
    %c0 = arith.constant 0 : index
    %c0_0 = arith.constant 0 : index
    %0 = vector.load %arg1[%c0, %c0_0] : memref<8x3072xf32, #tpu.memory_space<vmem>>, vector<8x3072xf32>
    %1 = arith.truncf %0 : vector<8x3072xf32> to vector<8x3072xbf16>
    %c0_1 = arith.constant 0 : index
    %c0_2 = arith.constant 0 : index
    %2 = vector.load %arg2[%c0_1, %c0_2] : memref<3072x128xbf16, #tpu.memory_space<vmem>>, vector<3072x128xbf16>
    %cst = arith.constant dense<0.000000e+00> : vector<8x128xf32>
    %3 = tpu.matmul %1, %2, %cst {dimension_numbers = #tpu.dot_dimension_numbers<[1], [0], [0], [1], [0, 0, 1, 1], [], []>} : vector<8x3072xbf16>, vector<3072x128xbf16>, vector<8x128xf32> -> vector<8x128xf32>
    %c0_3 = arith.constant 0 : index
    %c0_4 = arith.constant 0 : index
    %4 = vector.load %arg3[%c0_3, %c0_4] : memref<1x128xf32, #tpu.memory_space<vmem>>, vector<1x128xf32>
    %5 = vector.broadcast %4 : vector<1x128xf32> to vector<8x128xf32>
    %6 = arith.addf %3, %5 : vector<8x128xf32>
    %cst_5 = arith.constant 0.000000e+00 : f32
    %7 = vector.broadcast %cst_5 : f32 to vector<8x128xf32>
    %8 = arith.maximumf %6, %7 : vector<8x128xf32>
    %9 = arith.truncf %8 : vector<8x128xf32> to vector<8x128xbf16>
    %c0_6 = arith.constant 0 : index
    %c0_7 = arith.constant 0 : index
    %10 = vector.load %arg4[%c0_6, %c0_7] : memref<128x128xbf16, #tpu.memory_space<vmem>>, vector<128x128xbf16>
    %cst_8 = arith.constant dense<0.000000e+00> : vector<8x128xf32>
    %11 = tpu.matmul %9, %10, %cst_8 {dimension_numbers = #tpu.dot_dimension_numbers<[1], [0], [0], [1], [0, 0, 1, 1], [], []>} : vector<8x128xbf16>, vector<128x128xbf16>, vector<8x128xf32> -> vector<8x128xf32>
    %c0_9 = arith.constant 0 : index
    %c0_10 = arith.constant 0 : index
    %12 = vector.load %arg5[%c0_9, %c0_10] : memref<1x128xf32, #tpu.memory_space<vmem>>, vector<1x128xf32>
    %13 = vector.broadcast %12 : vector<1x128xf32> to vector<8x128xf32>
    %14 = arith.addf %11, %13 : vector<8x128xf32>
    %cst_11 = arith.constant 0.000000e+00 : f32
    %15 = vector.broadcast %cst_11 : f32 to vector<8x128xf32>
    %16 = arith.maximumf %14, %15 : vector<8x128xf32>
    %17 = arith.truncf %16 : vector<8x128xf32> to vector<8x128xbf16>
    %c0_12 = arith.constant 0 : index
    %c0_13 = arith.constant 0 : index
    %18 = vector.load %arg6[%c0_12, %c0_13] : memref<128x128xbf16, #tpu.memory_space<vmem>>, vector<128x128xbf16>
    %cst_14 = arith.constant dense<0.000000e+00> : vector<8x128xf32>
    %19 = tpu.matmul %17, %18, %cst_14 {dimension_numbers = #tpu.dot_dimension_numbers<[1], [0], [0], [1], [0, 0, 1, 1], [], []>} : vector<8x128xbf16>, vector<128x128xbf16>, vector<8x128xf32> -> vector<8x128xf32>
    %c0_15 = arith.constant 0 : index
    %c0_16 = arith.constant 0 : index
    %20 = vector.load %arg7[%c0_15, %c0_16] : memref<1x128xf32, #tpu.memory_space<vmem>>, vector<1x128xf32>
    %21 = vector.broadcast %20 : vector<1x128xf32> to vector<8x128xf32>
    %22 = arith.addf %19, %21 : vector<8x128xf32>
    %cst_17 = arith.constant dense<0xFF800000> : vector<8xf32>
    %23 = vector.multi_reduction <maximumf>, %22, %cst_17 [1] : vector<8x128xf32> to vector<8xf32>
    %24 = vector.shape_cast %23 : vector<8xf32> to vector<8x1xf32>
    %25 = vector.broadcast %24 : vector<8x1xf32> to vector<8x128xf32>
    %26 = arith.subf %22, %25 : vector<8x128xf32>
    %27 = tpu.iota {dimensions = array<i32: 1>} : vector<8x128xi32>
    %c10_i32 = arith.constant 10 : i32
    %28 = vector.broadcast %c10_i32 : i32 to vector<8x128xi32>
    %29 = arith.cmpi slt, %27, %28 : vector<8x128xi32>
    %30 = math.exp %26 : vector<8x128xf32>
    %cst_18 = arith.constant 0.000000e+00 : f32
    %31 = vector.broadcast %cst_18 : f32 to vector<8x128xf32>
    %32 = arith.select %29, %30, %31 : vector<8x128xi1>, vector<8x128xf32>
    %cst_19 = arith.constant dense<0.000000e+00> : vector<8xf32>
    %33 = vector.multi_reduction <add>, %32, %cst_19 [1] : vector<8x128xf32> to vector<8xf32>
    %34 = vector.shape_cast %33 : vector<8xf32> to vector<8x1xf32>
    %35 = math.log %34 : vector<8x1xf32>
    %36 = vector.broadcast %35 : vector<8x1xf32> to vector<8x128xf32>
    %37 = arith.subf %26, %36 : vector<8x128xf32>
    %c0_20 = arith.constant 0 : index
    %c0_21 = arith.constant 0 : index
    %38 = vector.load %arg8[%c0_20, %c0_21] : memref<8x128xf32, #tpu.memory_space<vmem>>, vector<8x128xf32>
    tpu.vector_store %arg8[%c0_20, %c0_21], %37 {strides = array<i32>} : memref<8x128xf32, #tpu.memory_space<vmem>>, vector<8x128xf32>,
    return
  }
  func.func @transform_0(%arg0: i32) -> (i32, i32) {
    %c0_i32 = arith.constant 0 : i32
    %c0_i32_0 = arith.constant 0 : i32
    return %arg0, %c0_i32 : i32, i32
  }
  func.func @transform_1(%arg0: i32) -> (i32, i32) {
    %c0_i32 = arith.constant 0 : i32
    %c0_i32_0 = arith.constant 0 : i32
    %c0_i32_1 = arith.constant 0 : i32
    return %c0_i32, %c0_i32_0 : i32, i32
  }
  func.func @transform_2(%arg0: i32) -> (i32, i32) {
    %c0_i32 = arith.constant 0 : i32
    %c0_i32_0 = arith.constant 0 : i32
    %c0_i32_1 = arith.constant 0 : i32
    return %c0_i32, %c0_i32_0 : i32, i32
  }
  func.func @transform_3(%arg0: i32) -> (i32, i32) {
    %c0_i32 = arith.constant 0 : i32
    %c0_i32_0 = arith.constant 0 : i32
    %c0_i32_1 = arith.constant 0 : i32
    return %c0_i32, %c0_i32_0 : i32, i32
  }
  func.func @transform_4(%arg0: i32) -> (i32, i32) {
    %c0_i32 = arith.constant 0 : i32
    %c0_i32_0 = arith.constant 0 : i32
    %c0_i32_1 = arith.constant 0 : i32
    return %c0_i32, %c0_i32_0 : i32, i32
  }
  func.func @transform_5(%arg0: i32) -> (i32, i32) {
    %c0_i32 = arith.constant 0 : i32
    %c0_i32_0 = arith.constant 0 : i32
    %c0_i32_1 = arith.constant 0 : i32
    return %c0_i32, %c0_i32_0 : i32, i32
  }
  func.func @transform_6(%arg0: i32) -> (i32, i32) {
    %c0_i32 = arith.constant 0 : i32
    %c0_i32_0 = arith.constant 0 : i32
    %c0_i32_1 = arith.constant 0 : i32
    return %c0_i32, %c0_i32_0 : i32, i32
  }
  func.func @transform_7(%arg0: i32) -> (i32, i32) {
    %c0_i32 = arith.constant 0 : i32
    %c0_i32_0 = arith.constant 0 : i32
    return %arg0, %c0_i32 : i32, i32
  }
}

</mosaic_0001>

<bundles_post_ra>
// kernel: tpu_custom_call.1
= control target key start
LH: loop header
LB: loop body
LE: loop exit
PB: predicated region body
PF: predicated region fallthrough
CT: control target
= control target key end

     0   :  { %12 = vsyncpa [#allocation3], 0  ;;  %s3372_s0 = inlined_call_operand.hbm [shape: f32[8,3072], index: 0, kind: input, shape index: {}]   ;;  %s3373_s1 = inlined_call_operand.hbm [shape: bf16[3072,128], index: 1, kind: input, shape index: {}]   ;;  %s3374_s2 = inlined_call_operand.vmem [shape: f32[1,128], index: 2, kind: input, shape index: {}]   ;;  %s3375_s3 = inlined_call_operand.hbm [shape: bf16[128,128], index: 3, kind: input, shape index: {}]   ;;  %s3376_s4 = inlined_call_operand.vmem [shape: f32[1,128], index: 4, kind: input, shape index: {}]   ;;  %s3377_s5 = inlined_call_operand.hbm [shape: bf16[128,128], index: 5, kind: input, shape index: {}]   ;;  %s3378_s6 = inlined_call_operand.vmem [shape: f32[1,128], index: 6, kind: input, shape index: {}]   ;;  %s3379_s7 = inlined_call_operand.hbm [shape: f32[8,128], index: 7, kind: output, shape index: {}]  }
   0x1   :  { %13 = vsyncpa [#allocation6], 0 }
   0x2   :  { %14 = vsyncpa [#allocation9], 0 }
   0x3   :  { %15 = vsyncpa [#allocation4], 0  ;;  %s3272_s24 = smov [#allocation5]  }
   0x4   :  { %s31_s25 = sshll.u32 %s3272_s24, 4  ;;  %s32_s25 = int_to_ptr.vmem [resolvable:$true] %s31_s25 }
   0x5   :  { %s3172_s26 = scalar_lea.vmem %s32_s25, 24576  ;;  %p3177_p1 = scmp.lt.s32.totalorder %s32_s25, %s32_s25 }
   0x6   :  { %p3173_p0 = scmp.ne.s32.totalorder %s32_s25, %s3172_s26  ;;  %p3178_p2 = scmp.lt.s32.totalorder %s3172_s26, %s3172_s26 }
   0x8   :  { %p3179_p3 = por %p3178_p2, %p3177_p1 }
   0xa   :  { %p3180_p4 = pnand %p3179_p3, %p3173_p0 }
   0xc   :  { %3183 = shalt.err (!%p3180_p4)
}
   0xd   :  { %s3273_s27 = smov 64   ;;  %s3274_s28 = smov 4  }
   0xe   :  { %37 = dma.hbm_to_vmem [thread:$0]  %s3373_s1, 24576, %s32_s25, [#allocation6], %s3273_s27, %s3273_s27, %s3274_s28  }
   0xf   :  { %s3275_s8 = smov [#allocation2]   ;;  %s3276_s10 = smov [#allocation7]  }
  0x10   :  { %s22_s9 = sshll.u32 %s3275_s8, 4  ;;  %s45_s11 = sshll.u32 %s3276_s10, 4  ;;  %s23_s9 = int_to_ptr.vmem [resolvable:$true] %s22_s9  ;;  %s46_s11 = int_to_ptr.vmem [resolvable:$true] %s45_s11 }
  0x11   :  { %s3192_s12 = scalar_lea.vmem %s23_s9, 3072  ;;  %p3197_p6 = scmp.lt.s32.totalorder %s23_s9, %s23_s9 }
  0x12   :  { %p3193_p5 = scmp.ne.s32.totalorder %s23_s9, %s3192_s12  ;;  %p3198_p7 = scmp.lt.s32.totalorder %s3192_s12, %s3192_s12 }
  0x14   :  { %p3199_p8 = por %p3198_p7, %p3197_p6 }
  0x16   :  { %p3200_p9 = pnand %p3199_p8, %p3193_p5 }
  0x18   :  { %3203 = shalt.err (!%p3200_p9)
}
  0x19   :  { %25 = dma.hbm_to_vmem [thread:$0]  %s3372_s0, 3072, %s23_s9, [#allocation3]  }
  0x1a   :  { %s3212_s15 = scalar_lea.vmem %s46_s11, 1024  ;;  %p3217_p11 = scmp.lt.s32.totalorder %s46_s11, %s46_s11 }
  0x1b   :  { %p3213_p10 = scmp.ne.s32.totalorder %s46_s11, %s3212_s15  ;;  %p3218_p12 = scmp.lt.s32.totalorder %s3212_s15, %s3212_s15 }
  0x1d   :  { %p3219_p13 = por %p3218_p12, %p3217_p11 }
  0x1f   :  { %p3220_p0 = pnand %p3219_p13, %p3213_p10 }
  0x21   :  { %3223 = shalt.err (!%p3220_p0)
}
  0x22   :  { %51 = dma.hbm_to_vmem [thread:$0]  %s3375_s3, 1024, %s46_s11, [#allocation6], %s3273_s27, %s3273_s27, %s3274_s28  }
  0x23   :  { %s3277_s17 = smov [#allocation8]  }
  0x24   :  { %s59_s18 = sshll.u32 %s3277_s17, 4  ;;  %s60_s18 = int_to_ptr.vmem [resolvable:$true] %s59_s18 }
  0x25   :  { %s3232_s19 = scalar_lea.vmem %s60_s18, 1024  ;;  %p3237_p2 = scmp.lt.s32.totalorder %s60_s18, %s60_s18 }
  0x26   :  { %p3233_p1 = scmp.ne.s32.totalorder %s60_s18, %s3232_s19  ;;  %p3238_p3 = scmp.lt.s32.totalorder %s3232_s19, %s3232_s19 }
  0x28   :  { %p3239_p4 = por %p3238_p3, %p3237_p2 }
  0x2a   :  { %p3240_p5 = pnand %p3239_p4, %p3233_p1 }
  0x2c   :  { %3243 = shalt.err (!%p3240_p5)
}
  0x2d   :  { %65 = dma.hbm_to_vmem [thread:$0]  %s3377_s5, 1024, %s60_s18, [#allocation9], %s3273_s27, %s3273_s27, %s3274_s28  }
  0x2e   :  { %3264 = dma.done.wait [#allocation3], 3072  }
  0x2f   :  { %3265 = vsyncadd [#allocation3], 4294964224 }
  0x30   :  { %3266 = dma.done.wait [#allocation6], 25600  }
  0x31   :  { %3267 = vsyncadd [#allocation6], 4294941696 }
  0x32   :  { %3268 = dma.done.wait [#allocation9], 1024  }
  0x33   :  { %3269 = vsyncadd [#allocation9], 4294966272  ;;  %v2952_v0 = vld [vmem:[#allocation5 + $0x78] sm:$0xff]   ;;  %v2956_v4 = vld [vmem:[#allocation5 + $0x70] sm:$0xff]   ;;  %vm3279_vm0 = vmmov 0  }
  0x34   :  { %v2953_v1 = vld [vmem:[#allocation5 + $0xf8] sm:$0xff]   ;;  %2621 = vmatprep.subr.bf16.mxu0 %v2952_v0  ;;  %v2957_v5 = vld [vmem:[#allocation5 + $0xf0] sm:$0xff]   ;;  %v2960_v8 = vld [vmem:[#allocation5 + $0x68] sm:$0xff]  }
  0x35   :  { %v2954_v2 = vld [vmem:[#allocation5 + $0x38] sm:$0xff]   ;;  %2643 = vmatprep.subr.bf16.mxu1 %v2953_v1  ;;  %v2958_v6 = vld [vmem:[#allocation5 + $0x30] sm:$0xff]   ;;  %v2961_v9 = vld [vmem:[#allocation5 + $0xe8] sm:$0xff]  }
  0x36   :  { %v2955_v3 = vld [vmem:[#allocation5 + $0xb8] sm:$0xff]   ;;  %2622 = vmatpush3.bf16.msra.mxu0 %v2954_v2  ;;  %v2959_v7 = vld [vmem:[#allocation5 + $0xb0] sm:$0xff]   ;;  %v2962_v10 = vld [vmem:[#allocation5 + $0x28] sm:$0xff]  }
  0x37   :  { %2644 = vmatpush3.bf16.msra.mxu1 %v2955_v3  ;;  %2623 = vmatprep.subr.bf16.mxu0 %v2956_v4  ;;  %v2963_v11 = vld [vmem:[#allocation5 + $0xa8] sm:$0xff]   ;;  %v2964_v12 = vld [vmem:[#allocation5 + $0x60] sm:$0xff]   ;;  %v2968_v16 = vld [vmem:[#allocation5 + $0x58] sm:$0xff]  }
  0x38   :  { %2645 = vmatprep.subr.bf16.mxu1 %v2957_v5  ;;  %v2965_v13 = vld [vmem:[#allocation5 + $0xe0] sm:$0xff]   ;;  %v2969_v17 = vld [vmem:[#allocation5 + $0xd8] sm:$0xff]   ;;  %v2972_v20 = vld [vmem:[#allocation5 + $0x50] sm:$0xff]  }
  0x39   :  { %v2966_v14 = vld [vmem:[#allocation5 + $0x20] sm:$0xff]   ;;  %v2970_v18 = vld [vmem:[#allocation5 + $0x18] sm:$0xff]   ;;  %v2973_v21 = vld [vmem:[#allocation5 + $0xd0] sm:$0xff]  }
  0x3a   :  { %2624 = vmatpush3.bf16.msra.mxu0 %v2958_v6  ;;  %v2967_v15 = vld [vmem:[#allocation5 + $0xa0] sm:$0xff]   ;;  %v2971_v19 = vld [vmem:[#allocation5 + $0x98] sm:$0xff]   ;;  %v2974_v22 = vld [vmem:[#allocation5 + $0x10] sm:$0xff]  }
  0x3b   :  { %2646 = vmatpush3.bf16.msra.mxu1 %v2959_v7  ;;  %2625 = vmatprep.subr.bf16.mxu0 %v2960_v8  ;;  %v2975_v23 = vld [vmem:[#allocation5 + $0x90] sm:$0xff]   ;;  %v2976_v24 = vld [vmem:[#allocation5 + $0x48] sm:$0xff]   ;;  %v2980_v28 = vld [vmem:[#allocation5 + $0x40] sm:$0xff]  }
  0x3c   :  { %2647 = vmatprep.subr.bf16.mxu1 %v2961_v9  ;;  %v2977_v25 = vld [vmem:[#allocation5 + $0xc8] sm:$0xff]   ;;  %v2981_v29 = vld [vmem:[#allocation5 + $0xc0] sm:$0xff]   ;;  %v84_v33 = vld [vmem:[#allocation2 + $0x18] sm:$0xff] }
  0x3d   :  { %v2978_v26 = vld [vmem:[#allocation5 + $0x8] sm:$0xff]   ;;  %v2982_v30 = vld [vmem:[#allocation5] sm:$0xff]   ;;  %v108_v36 = vpack.c.bf16 %v84_v33, %v84_v33  ;;  %v83_v38 = vld [vmem:[#allocation2 + $0x10] sm:$0xff] }
  0x3e   :  { %2626 = vmatpush3.bf16.msra.mxu0 %v2962_v10  ;;  %v2979_v27 = vld [vmem:[#allocation5 + $0x88] sm:$0xff]   ;;  %v2983_v31 = vld [vmem:[#allocation5 + $0x80] sm:$0xff]   ;;  %v107_v39 = vpack.c.bf16 %v83_v38, %v83_v38  ;;  %v2984_v40 = vld [vmem:[#allocation5 + $0x178] sm:$0xff]  }
  0x3f   :  { %2648 = vmatpush3.bf16.msra.mxu1 %v2963_v11  ;;  %2627 = vmatprep.subr.bf16.mxu0 %v2964_v12  ;;  %v82_v32 = vld [vmem:[#allocation2 + $0x8] sm:$0xff]  ;;  %v81_v34 = vld [vmem:[#allocation2] sm:$0xff]  ;;  %v2985_v41 = vld [vmem:[#allocation5 + $0x1f8] sm:$0xff]  }
  0x40   :  { %2649 = vmatprep.subr.bf16.mxu1 %v2965_v13  ;;  %v106_v35 = vpack.c.bf16 %v82_v32, %v82_v32  ;;  %v105_v37 = vpack.c.bf16 %v81_v34, %v81_v34  ;;  %1744 = vmatprep.mubr.bf16.mxu1 %v108_v36  ;;  %v2986_v42 = vld [vmem:[#allocation5 + $0x138] sm:$0xff]   ;;  %v2988_v44 = vld [vmem:[#allocation5 + $0x170] sm:$0xff]   ;;  %v2992_v48 = vld [vmem:[#allocation5 + $0x168] sm:$0xff]  }
  0x41   :  { %v2987_v43 = vld [vmem:[#allocation5 + $0x1b8] sm:$0xff]   ;;  %v2989_v45 = vld [vmem:[#allocation5 + $0x1f0] sm:$0xff]   ;;  %v2993_v49 = vld [vmem:[#allocation5 + $0x1e8] sm:$0xff]  }
  0x42   :  { %2628 = vmatpush3.bf16.msra.mxu0 %v2966_v14  ;;  %1704 = vmatprep.mubr.bf16.mxu0 %v106_v35  ;;  %v2990_v46 = vld [vmem:[#allocation5 + $0x130] sm:$0xff]   ;;  %v2994_v50 = vld [vmem:[#allocation5 + $0x128] sm:$0xff]   ;;  %v2996_v52 = vld [vmem:[#allocation5 + $0x160] sm:$0xff]  }
  0x43   :  { %2650 = vmatpush3.bf16.msra.mxu1 %v2967_v15  ;;  %2629 = vmatprep.subr.bf16.mxu0 %v2968_v16  ;;  %v2991_v47 = vld [vmem:[#allocation5 + $0x1b0] sm:$0xff]   ;;  %v2995_v51 = vld [vmem:[#allocation5 + $0x1a8] sm:$0xff]   ;;  %v2997_v53 = vld [vmem:[#allocation5 + $0x1e0] sm:$0xff]  }
  0x44   :  { %2651 = vmatprep.subr.bf16.mxu1 %v2969_v17  ;;  %v2998_v54 = vld [vmem:[#allocation5 + $0x120] sm:$0xff]   ;;  %v3000_v56 = vld [vmem:[#allocation5 + $0x158] sm:$0xff]   ;;  %v3004_v60 = vld [vmem:[#allocation5 + $0x150] sm:$0xff]  }
  0x45   :  { %v2999_v55 = vld [vmem:[#allocation5 + $0x1a0] sm:$0xff]   ;;  %v3001_v57 = vld [vmem:[#allocation5 + $0x1d8] sm:$0xff]   ;;  %v3005_v61 = vld [vmem:[#allocation5 + $0x1d0] sm:$0xff]  }
  0x46   :  { %2630 = vmatpush3.bf16.msra.mxu0 %v2970_v18  ;;  %v3002_v58 = vld [vmem:[#allocation5 + $0x118] sm:$0xff]   ;;  %v3006_v62 = vld [vmem:[#allocation5 + $0x110] sm:$0xff]   ;;  %v3008_v0 = vld [vmem:[#allocation5 + $0x148] sm:$0xff]  }
  0x47   :  { %2652 = vmatpush3.bf16.msra.mxu1 %v2971_v19  ;;  %2631 = vmatprep.subr.bf16.mxu0 %v2972_v20  ;;  %v3003_v59 = vld [vmem:[#allocation5 + $0x198] sm:$0xff]   ;;  %v3007_v63 = vld [vmem:[#allocation5 + $0x190] sm:$0xff]   ;;  %v3009_v1 = vld [vmem:[#allocation5 + $0x1c8] sm:$0xff]  }
  0x48   :  { %2653 = vmatprep.subr.bf16.mxu1 %v2973_v21  ;;  %v3010_v2 = vld [vmem:[#allocation5 + $0x108] sm:$0xff]   ;;  %v3012_v4 = vld [vmem:[#allocation5 + $0x140] sm:$0xff]   ;;  %v88_v9 = vld [vmem:[#allocation2 + $0x38] sm:$0xff] }
  0x49   :  { %v3011_v3 = vld [vmem:[#allocation5 + $0x188] sm:$0xff]   ;;  %v3013_v5 = vld [vmem:[#allocation5 + $0x1c0] sm:$0xff]   ;;  %v112_v11 = vpack.c.bf16 %v88_v9, %v88_v9  ;;  %v87_v13 = vld [vmem:[#allocation2 + $0x30] sm:$0xff] }
  0x4a   :  { %2632 = vmatpush3.bf16.msra.mxu0 %v2974_v22  ;;  %v3014_v6 = vld [vmem:[#allocation5 + $0x100] sm:$0xff]   ;;  %v86_v8 = vld [vmem:[#allocation2 + $0x28] sm:$0xff]  ;;  %v111_v15 = vpack.c.bf16 %v87_v13, %v87_v13  ;;  %v3016_v16 = vld [vmem:[#allocation5 + $0x278] sm:$0xff]  }
  0x4b   :  { %2654 = vmatpush3.bf16.msra.mxu1 %v2975_v23  ;;  %2633 = vmatprep.subr.bf16.mxu0 %v2976_v24  ;;  %v3015_v7 = vld [vmem:[#allocation5 + $0x180] sm:$0xff]   ;;  %v110_v10 = vpack.c.bf16 %v86_v8, %v86_v8  ;;  %v3017_v17 = vld [vmem:[#allocation5 + $0x2f8] sm:$0xff]   ;;  %v3020_v20 = vld [vmem:[#allocation5 + $0x270] sm:$0xff]  }
  0x4c   :  { %2655 = vmatprep.subr.bf16.mxu1 %v2977_v25  ;;  %v85_v12 = vld [vmem:[#allocation2 + $0x20] sm:$0xff]  ;;  %v3018_v18 = vld [vmem:[#allocation5 + $0x238] sm:$0xff]   ;;  %v3021_v21 = vld [vmem:[#allocation5 + $0x2f0] sm:$0xff]  }
  0x4d   :  { %v109_v14 = vpack.c.bf16 %v85_v12, %v85_v12  ;;  %v3019_v19 = vld [vmem:[#allocation5 + $0x2b8] sm:$0xff]   ;;  %v3022_v22 = vld [vmem:[#allocation5 + $0x230] sm:$0xff]   ;;  %v3024_v24 = vld [vmem:[#allocation5 + $0x268] sm:$0xff]  }
  0x4e   :  { %2634 = vmatpush3.bf16.msra.mxu0 %v2978_v26  ;;  %v3023_v23 = vld [vmem:[#allocation5 + $0x2b0] sm:$0xff]   ;;  %v3025_v25 = vld [vmem:[#allocation5 + $0x2e8] sm:$0xff]   ;;  %v3032_v32 = vld [vmem:[#allocation5 + $0x258] sm:$0xff]  }
  0x4f   :  { %2656 = vmatpush3.bf16.msra.mxu1 %v2979_v27  ;;  %2635 = vmatprep.subr.bf16.mxu0 %v2980_v28  ;;  %v3026_v26 = vld [vmem:[#allocation5 + $0x228] sm:$0xff]   ;;  %v3028_v28 = vld [vmem:[#allocation5 + $0x260] sm:$0xff]   ;;  %v3033_v33 = vld [vmem:[#allocation5 + $0x2d8] sm:$0xff]  }
  0x50   :  { %2657 = vmatprep.subr.bf16.mxu1 %v2981_v29  ;;  %v3027_v27 = vld [vmem:[#allocation5 + $0x2a8] sm:$0xff]   ;;  %v3029_v29 = vld [vmem:[#allocation5 + $0x2e0] sm:$0xff]   ;;  %v3034_v34 = vld [vmem:[#allocation5 + $0x218] sm:$0xff]  }
  0x51   :  { %v3035_v35 = vld [vmem:[#allocation5 + $0x298] sm:$0xff]   ;;  %v3036_v36 = vld [vmem:[#allocation5 + $0x250] sm:$0xff]  }
  0x52   :  { %2636 = vmatpush3.bf16.msra.mxu0 %v2982_v30  ;;  %v3030_v30 = vld [vmem:[#allocation5 + $0x220] sm:$0xff]   ;;  %v3038_v38 = vld [vmem:[#allocation5 + $0x210] sm:$0xff]   ;;  %v3064_v8 = vld [vmem:[#allocation5 + $0x358] sm:$0xff]  }
  0x53   :  { %2658 = vmatpush3.bf16.msra.mxu1 %v2983_v31  ;;  %2665 = vmatprep.subr.bf16.mxu0 %v2984_v40  ;;  %v3031_v31 = vld [vmem:[#allocation5 + $0x2a0] sm:$0xff]   ;;  %v3040_v40 = vld [vmem:[#allocation5 + $0x248] sm:$0xff]   ;;  %v3065_v9 = vld [vmem:[#allocation5 + $0x3d8] sm:$0xff]  }
  0x54   :  { %2687 = vmatprep.subr.bf16.mxu1 %v2985_v41  ;;  %v3041_v41 = vld [vmem:[#allocation5 + $0x2c8] sm:$0xff]   ;;  %v3068_v12 = vld [vmem:[#allocation5 + $0x350] sm:$0xff]  }
  0x55   :  { %1705 = vmatmul.mubr.bf16.vlgmr.msra.gmra.mxu0 %v105_v37  ;;  %v3037_v37 = vld [vmem:[#allocation5 + $0x2d0] sm:$0xff]  }
  0x56   :  { %1745 = vmatmul.mubr.bf16.vlgmr.msra.gmra.mxu1 %v107_v39  ;;  %2666 = vmatpush3.bf16.msra.mxu0 %v2986_v42  ;;  %v3039_v39 = vld [vmem:[#allocation5 + $0x290] sm:$0xff]   ;;  %v3042_v42 = vld [vmem:[#allocation5 + $0x208] sm:$0xff]  }
  0x57   :  { %2688 = vmatpush3.bf16.msra.mxu1 %v2987_v43  ;;  %2667 = vmatprep.subr.bf16.mxu0 %v2988_v44  ;;  %v3043_v43 = vld [vmem:[#allocation5 + $0x288] sm:$0xff]   ;;  %v3044_v44 = vld [vmem:[#allocation5 + $0x240] sm:$0xff]   ;;  %v3069_v13 = vld [vmem:[#allocation5 + $0x3d0] sm:$0xff]  }
  0x58   :  { %2689 = vmatprep.subr.bf16.mxu1 %v2989_v45  ;;  %1784 = vmatprep.mubr.bf16.mxu0 %v110_v10  ;;  %v3045_v45 = vld [vmem:[#allocation5 + $0x2c0] sm:$0xff]   ;;  %v3066_v10 = vld [vmem:[#allocation5 + $0x318] sm:$0xff]  }
  0x59   :  { %1824 = vmatprep.mubr.bf16.mxu1 %v112_v11  ;;  %v3067_v11 = vld [vmem:[#allocation5 + $0x398] sm:$0xff]  }
  0x5a   :  { %2668 = vmatpush3.bf16.msra.mxu0 %v2990_v46  ;;  %v3046_v46 = vld [vmem:[#allocation5 + $0x200] sm:$0xff]  }
  0x5b   :  { %2690 = vmatpush3.bf16.msra.mxu1 %v2991_v47  ;;  %2669 = vmatprep.subr.bf16.mxu0 %v2992_v48  ;;  %v3047_v47 = vld [vmem:[#allocation5 + $0x280] sm:$0xff]   ;;  %v90_v48 = vld [vmem:[#allocation2 + $0x48] sm:$0xff] }
  0x5c   :  { %2691 = vmatprep.subr.bf16.mxu1 %v2993_v49  ;;  %v114_v49 = vpack.c.bf16 %v90_v48, %v90_v48  ;;  %v3096_v48 = vld [vmem:[#allocation5 + $0x458] sm:$0xff]  }
  0x5e   :  { %2670 = vmatpush3.bf16.msra.mxu0 %v2994_v50  ;;  %v92_v50 = vld [vmem:[#allocation2 + $0x58] sm:$0xff] }
  0x5f   :  { %2692 = vmatpush3.bf16.msra.mxu1 %v2995_v51  ;;  %2671 = vmatprep.subr.bf16.mxu0 %v2996_v52  ;;  %v89_v51 = vld [vmem:[#allocation2 + $0x40] sm:$0xff]  ;;  %v91_v52 = vld [vmem:[#allocation2 + $0x50] sm:$0xff] }
  0x60   :  { %2693 = vmatprep.subr.bf16.mxu1 %v2997_v53  ;;  %v116_v53 = vpack.c.bf16 %v92_v50, %v92_v50  ;;  %v3098_v50 = vld [vmem:[#allocation5 + $0x418] sm:$0xff]  }
  0x62   :  { %2672 = vmatpush3.bf16.msra.mxu0 %v2998_v54  ;;  %v113_v54 = vpack.c.bf16 %v89_v51, %v89_v51  ;;  %v3099_v51 = vld [vmem:[#allocation5 + $0x498] sm:$0xff]  }
  0x63   :  { %2694 = vmatpush3.bf16.msra.mxu1 %v2999_v55  ;;  %2673 = vmatprep.subr.bf16.mxu0 %v3000_v56  ;;  %v115_v55 = vpack.c.bf16 %v91_v52, %v91_v52  ;;  %v3048_v56 = vld [vmem:[#allocation5 + $0x378] sm:$0xff]   ;;  %v3100_v52 = vld [vmem:[#allocation5 + $0x450] sm:$0xff]  }
  0x64   :  { %2695 = vmatprep.subr.bf16.mxu1 %v3001_v57  ;;  %v3049_v57 = vld [vmem:[#allocation5 + $0x3f8] sm:$0xff]  }
  0x66   :  { %2674 = vmatpush3.bf16.msra.mxu0 %v3002_v58  ;;  %v3050_v58 = vld [vmem:[#allocation5 + $0x338] sm:$0xff]  }
  0x67   :  { %2696 = vmatpush3.bf16.msra.mxu1 %v3003_v59  ;;  %2675 = vmatprep.subr.bf16.mxu0 %v3004_v60  ;;  %v3051_v59 = vld [vmem:[#allocation5 + $0x3b8] sm:$0xff]   ;;  %v3052_v60 = vld [vmem:[#allocation5 + $0x370] sm:$0xff]  }
  0x68   :  { %2697 = vmatprep.subr.bf16.mxu1 %v3005_v61  ;;  %v3053_v61 = vld [vmem:[#allocation5 + $0x3f0] sm:$0xff]  }
  0x6a   :  { %2676 = vmatpush3.bf16.msra.mxu0 %v3006_v62  ;;  %v3054_v62 = vld [vmem:[#allocation5 + $0x330] sm:$0xff]  }
  0x6b   :  { %2698 = vmatpush3.bf16.msra.mxu1 %v3007_v63  ;;  %2677 = vmatprep.subr.bf16.mxu0 %v3008_v0  ;;  %v3055_v63 = vld [vmem:[#allocation5 + $0x3b0] sm:$0xff]   ;;  %v3056_v0 = vld [vmem:[#allocation5 + $0x368] sm:$0xff]  }
  0x6c   :  { %2699 = vmatprep.subr.bf16.mxu1 %v3009_v1  ;;  %v3057_v1 = vld [vmem:[#allocation5 + $0x3e8] sm:$0xff]  }
  0x6e   :  { %2678 = vmatpush3.bf16.msra.mxu0 %v3010_v2  ;;  %v3058_v2 = vld [vmem:[#allocation5 + $0x328] sm:$0xff]  }
  0x6f   :  { %2700 = vmatpush3.bf16.msra.mxu1 %v3011_v3  ;;  %2679 = vmatprep.subr.bf16.mxu0 %v3012_v4  ;;  %v3059_v3 = vld [vmem:[#allocation5 + $0x3a8] sm:$0xff]   ;;  %v3060_v4 = vld [vmem:[#allocation5 + $0x360] sm:$0xff]  }
  0x70   :  { %2701 = vmatprep.subr.bf16.mxu1 %v3013_v5  ;;  %v3061_v5 = vld [vmem:[#allocation5 + $0x3e0] sm:$0xff]  }
  0x72   :  { %2680 = vmatpush3.bf16.msra.mxu0 %v3014_v6  ;;  %v3062_v6 = vld [vmem:[#allocation5 + $0x320] sm:$0xff]  }
  0x73   :  { %2702 = vmatpush3.bf16.msra.mxu1 %v3015_v7  ;;  %2709 = vmatprep.subr.bf16.mxu0 %v3016_v16  ;;  %v3063_v7 = vld [vmem:[#allocation5 + $0x3a0] sm:$0xff]   ;;  %v3072_v16 = vld [vmem:[#allocation5 + $0x348] sm:$0xff]  }
  0x74   :  { %2731 = vmatprep.subr.bf16.mxu1 %v3017_v17  ;;  %v3073_v17 = vld [vmem:[#allocation5 + $0x3c8] sm:$0xff]  }
  0x75   :  { %1785 = vmatmul.mubr.bf16.vlgmr.msra.gmra.mxu0 %v109_v14  ;;  %v3070_v14 = vld [vmem:[#allocation5 + $0x310] sm:$0xff]  }
  0x76   :  { %1825 = vmatmul.mubr.bf16.vlgmr.msra.gmra.mxu1 %v111_v15  ;;  %2710 = vmatpush3.bf16.msra.mxu0 %v3018_v18  ;;  %v3071_v15 = vld [vmem:[#allocation5 + $0x390] sm:$0xff]   ;;  %v3074_v18 = vld [vmem:[#allocation5 + $0x308] sm:$0xff]  }
  0x77   :  { %2732 = vmatpush3.bf16.msra.mxu1 %v3019_v19  ;;  %2711 = vmatprep.subr.bf16.mxu0 %v3020_v20  ;;  %v3075_v19 = vld [vmem:[#allocation5 + $0x388] sm:$0xff]   ;;  %v3076_v20 = vld [vmem:[#allocation5 + $0x340] sm:$0xff]  }
  0x78   :  { %2733 = vmatprep.subr.bf16.mxu1 %v3021_v21  ;;  %1864 = vmatprep.mubr.bf16.mxu0 %v114_v49  ;;  %v3077_v21 = vld [vmem:[#allocation5 + $0x3c0] sm:$0xff]   ;;  %v3097_v49 = vld [vmem:[#allocation5 + $0x4d8] sm:$0xff]  }
  0x79   :  { %1904 = vmatprep.mubr.bf16.mxu1 %v116_v53  ;;  %v3101_v53 = vld [vmem:[#allocation5 + $0x4d0] sm:$0xff]  }
  0x7a   :  { %2712 = vmatpush3.bf16.msra.mxu0 %v3022_v22  ;;  %v3078_v22 = vld [vmem:[#allocation5 + $0x300] sm:$0xff]  }
  0x7b   :  { %2734 = vmatpush3.bf16.msra.mxu1 %v3023_v23  ;;  %2713 = vmatprep.subr.bf16.mxu0 %v3024_v24  ;;  %v3079_v23 = vld [vmem:[#allocation5 + $0x380] sm:$0xff]   ;;  %v94_v24 = vld [vmem:[#allocation2 + $0x68] sm:$0xff] }
  0x7c   :  { %2735 = vmatprep.subr.bf16.mxu1 %v3025_v25  ;;  %v96_v25 = vld [vmem:[#allocation2 + $0x78] sm:$0xff] }
  0x7e   :  { %2714 = vmatpush3.bf16.msra.mxu0 %v3026_v26  ;;  %v93_v26 = vld [vmem:[#allocation2 + $0x60] sm:$0xff] }
  0x7f   :  { %2736 = vmatpush3.bf16.msra.mxu1 %v3027_v27  ;;  %2715 = vmatprep.subr.bf16.mxu0 %v3028_v28  ;;  %v118_v27 = vpack.c.bf16 %v94_v24, %v94_v24  ;;  %v120_v28 = vpack.c.bf16 %v96_v25, %v96_v25  ;;  %v3128_v24 = vld [vmem:[#allocation5 + $0x558] sm:$0xff]  }
  0x80   :  { %2737 = vmatprep.subr.bf16.mxu1 %v3029_v29  ;;  %v117_v29 = vpack.c.bf16 %v93_v26, %v93_v26  ;;  %v3129_v25 = vld [vmem:[#allocation5 + $0x5d8] sm:$0xff]  }
  0x81   :  { %v3130_v26 = vld [vmem:[#allocation5 + $0x518] sm:$0xff]  }
  0x82   :  { %2716 = vmatpush3.bf16.msra.mxu0 %v3030_v30  ;;  %v95_v30 = vld [vmem:[#allocation2 + $0x70] sm:$0xff] }
  0x83   :  { %2738 = vmatpush3.bf16.msra.mxu1 %v3031_v31  ;;  %2717 = vmatprep.subr.bf16.mxu0 %v3032_v32  ;;  %v119_v31 = vpack.c.bf16 %v95_v30, %v95_v30  ;;  %v3080_v32 = vld [vmem:[#allocation5 + $0x478] sm:$0xff]   ;;  %v3134_v30 = vld [vmem:[#allocation5 + $0x510] sm:$0xff]  }
  0x84   :  { %2739 = vmatprep.subr.bf16.mxu1 %v3033_v33  ;;  %v3081_v33 = vld [vmem:[#allocation5 + $0x4f8] sm:$0xff]  }
  0x86   :  { %2718 = vmatpush3.bf16.msra.mxu0 %v3034_v34  ;;  %v3082_v34 = vld [vmem:[#allocation5 + $0x438] sm:$0xff]  }
  0x87   :  { %2740 = vmatpush3.bf16.msra.mxu1 %v3035_v35  ;;  %2719 = vmatprep.subr.bf16.mxu0 %v3036_v36  ;;  %v3083_v35 = vld [vmem:[#allocation5 + $0x4b8] sm:$0xff]   ;;  %v3084_v36 = vld [vmem:[#allocation5 + $0x470] sm:$0xff]  }
  0x88   :  { %2741 = vmatprep.subr.bf16.mxu1 %v3037_v37  ;;  %v3085_v37 = vld [vmem:[#allocation5 + $0x4f0] sm:$0xff]  }
  0x8a   :  { %2720 = vmatpush3.bf16.msra.mxu0 %v3038_v38  ;;  %v3086_v38 = vld [vmem:[#allocation5 + $0x430] sm:$0xff]  }
  0x8b   :  { %2742 = vmatpush3.bf16.msra.mxu1 %v3039_v39  ;;  %2721 = vmatprep.subr.bf16.mxu0 %v3040_v40  ;;  %v3087_v39 = vld [vmem:[#allocation5 + $0x4b0] sm:$0xff]   ;;  %v3088_v40 = vld [vmem:[#allocation5 + $0x468] sm:$0xff]  }
  0x8c   :  { %2743 = vmatprep.subr.bf16.mxu1 %v3041_v41  ;;  %v3089_v41 = vld [vmem:[#allocation5 + $0x4e8] sm:$0xff]  }
  0x8e   :  { %2722 = vmatpush3.bf16.msra.mxu0 %v3042_v42  ;;  %v3090_v42 = vld [vmem:[#allocation5 + $0x428] sm:$0xff]  }
  0x8f   :  { %2744 = vmatpush3.bf16.msra.mxu1 %v3043_v43  ;;  %2723 = vmatprep.subr.bf16.mxu0 %v3044_v44  ;;  %v3091_v43 = vld [vmem:[#allocation5 + $0x4a8] sm:$0xff]   ;;  %v3092_v44 = vld [vmem:[#allocation5 + $0x460] sm:$0xff]  }
  0x90   :  { %2745 = vmatprep.subr.bf16.mxu1 %v3045_v45  ;;  %v3093_v45 = vld [vmem:[#allocation5 + $0x4e0] sm:$0xff]  }
  0x92   :  { %2724 = vmatpush3.bf16.msra.mxu0 %v3046_v46  ;;  %v3094_v46 = vld [vmem:[#allocation5 + $0x420] sm:$0xff]  }
  0x93   :  { %2746 = vmatpush3.bf16.msra.mxu1 %v3047_v47  ;;  %2753 = vmatprep.subr.bf16.mxu0 %v3048_v56  ;;  %v3095_v47 = vld [vmem:[#allocation5 + $0x4a0] sm:$0xff]   ;;  %v3104_v56 = vld [vmem:[#allocation5 + $0x448] sm:$0xff]  }
  0x94   :  { %2775 = vmatprep.subr.bf16.mxu1 %v3049_v57  ;;  %v3105_v57 = vld [vmem:[#allocation5 + $0x4c8] sm:$0xff]  }
  0x95   :  { %1865 = vmatmul.mubr.bf16.vlgmr.msra.gmra.mxu0 %v113_v54  ;;  %v3102_v54 = vld [vmem:[#allocation5 + $0x410] sm:$0xff]  }
  0x96   :  { %1905 = vmatmul.mubr.bf16.vlgmr.msra.gmra.mxu1 %v115_v55  ;;  %2754 = vmatpush3.bf16.msra.mxu0 %v3050_v58  ;;  %v3103_v55 = vld [vmem:[#allocation5 + $0x490] sm:$0xff]   ;;  %v3106_v58 = vld [vmem:[#allocation5 + $0x408] sm:$0xff]  }
  0x97   :  { %2776 = vmatpush3.bf16.msra.mxu1 %v3051_v59  ;;  %2755 = vmatprep.subr.bf16.mxu0 %v3052_v60  ;;  %v3107_v59 = vld [vmem:[#allocation5 + $0x488] sm:$0xff]   ;;  %v3108_v60 = vld [vmem:[#allocation5 + $0x440] sm:$0xff]  }
  0x98   :  { %2777 = vmatprep.subr.bf16.mxu1 %v3053_v61  ;;  %1944 = vmatprep.mubr.bf16.mxu0 %v118_v27  ;;  %v3109_v61 = vld [vmem:[#allocation5 + $0x4c0] sm:$0xff]   ;;  %v3131_v27 = vld [vmem:[#allocation5 + $0x598] sm:$0xff]  }
  0x99   :  { %1984 = vmatprep.mubr.bf16.mxu1 %v120_v28  ;;  %v3132_v28 = vld [vmem:[#allocation5 + $0x550] sm:$0xff]  }
  0x9a   :  { %2756 = vmatpush3.bf16.msra.mxu0 %v3054_v62  ;;  %v3110_v62 = vld [vmem:[#allocation5 + $0x400] sm:$0xff]  }
  0x9b   :  { %2778 = vmatpush3.bf16.msra.mxu1 %v3055_v63  ;;  %2757 = vmatprep.subr.bf16.mxu0 %v3056_v0  ;;  %v3111_v63 = vld [vmem:[#allocation5 + $0x480] sm:$0xff]   ;;  %v98_v0 = vld [vmem:[#allocation2 + $0x88] sm:$0xff] }
  0x9c   :  { %2779 = vmatprep.subr.bf16.mxu1 %v3057_v1  ;;  %v100_v1 = vld [vmem:[#allocation2 + $0x98] sm:$0xff] }
  0x9e   :  { %2758 = vmatpush3.bf16.msra.mxu0 %v3058_v2  ;;  %v122_v2 = vpack.c.bf16 %v98_v0, %v98_v0  ;;  %v3146_v0 = vld [vmem:[#allocation7 + $0x28] sm:$0xff]  }
  0x9f   :  { %2780 = vmatpush3.bf16.msra.mxu1 %v3059_v3  ;;  %2759 = vmatprep.subr.bf16.mxu0 %v3060_v4  ;;  %v124_v3 = vpack.c.bf16 %v100_v1, %v100_v1  ;;  %v97_v4 = vld [vmem:[#allocation2 + $0x80] sm:$0xff] }
  0xa0   :  { %2781 = vmatprep.subr.bf16.mxu1 %v3061_v5  ;;  %v99_v5 = vld [vmem:[#allocation2 + $0x90] sm:$0xff]  ;;  %v3147_v1 = vld [vmem:[#allocation7 + $0x20] sm:$0xff]  }
  0xa2   :  { %2760 = vmatpush3.bf16.msra.mxu0 %v3062_v6  ;;  %v121_v6 = vpack.c.bf16 %v97_v4, %v97_v4 }
  0xa3   :  { %2782 = vmatpush3.bf16.msra.mxu1 %v3063_v7  ;;  %2761 = vmatprep.subr.bf16.mxu0 %v3064_v8  ;;  %v123_v7 = vpack.c.bf16 %v99_v5, %v99_v5  ;;  %v3112_v8 = vld [vmem:[#allocation5 + $0x578] sm:$0xff]  }
  0xa4   :  { %2783 = vmatprep.subr.bf16.mxu1 %v3065_v9  ;;  %v3113_v9 = vld [vmem:[#allocation5 + $0x5f8] sm:$0xff]  }
  0xa6   :  { %2762 = vmatpush3.bf16.msra.mxu0 %v3066_v10  ;;  %v3114_v10 = vld [vmem:[#allocation5 + $0x538] sm:$0xff]  }
  0xa7   :  { %2784 = vmatpush3.bf16.msra.mxu1 %v3067_v11  ;;  %2763 = vmatprep.subr.bf16.mxu0 %v3068_v12  ;;  %v3115_v11 = vld [vmem:[#allocation5 + $0x5b8] sm:$0xff]   ;;  %v3116_v12 = vld [vmem:[#allocation5 + $0x570] sm:$0xff]  }
  0xa8   :  { %2785 = vmatprep.subr.bf16.mxu1 %v3069_v13  ;;  %v3117_v13 = vld [vmem:[#allocation5 + $0x5f0] sm:$0xff]  }
  0xaa   :  { %2764 = vmatpush3.bf16.msra.mxu0 %v3070_v14  ;;  %v3118_v14 = vld [vmem:[#allocation5 + $0x530] sm:$0xff]  }
  0xab   :  { %2786 = vmatpush3.bf16.msra.mxu1 %v3071_v15  ;;  %2765 = vmatprep.subr.bf16.mxu0 %v3072_v16  ;;  %v3119_v15 = vld [vmem:[#allocation5 + $0x5b0] sm:$0xff]   ;;  %v3120_v16 = vld [vmem:[#allocation5 + $0x568] sm:$0xff]  }
  0xac   :  { %2787 = vmatprep.subr.bf16.mxu1 %v3073_v17  ;;  %v3121_v17 = vld [vmem:[#allocation5 + $0x5e8] sm:$0xff]  }
  0xae   :  { %2766 = vmatpush3.bf16.msra.mxu0 %v3074_v18  ;;  %v3122_v18 = vld [vmem:[#allocation5 + $0x528] sm:$0xff]  }
  0xaf   :  { %2788 = vmatpush3.bf16.msra.mxu1 %v3075_v19  ;;  %2767 = vmatprep.subr.bf16.mxu0 %v3076_v20  ;;  %v3123_v19 = vld [vmem:[#allocation5 + $0x5a8] sm:$0xff]   ;;  %v3124_v20 = vld [vmem:[#allocation5 + $0x560] sm:$0xff]  }
  0xb0   :  { %2789 = vmatprep.subr.bf16.mxu1 %v3077_v21  ;;  %v3125_v21 = vld [vmem:[#allocation5 + $0x5e0] sm:$0xff]  }
  0xb2   :  { %2768 = vmatpush3.bf16.msra.mxu0 %v3078_v22  ;;  %v3126_v22 = vld [vmem:[#allocation5 + $0x520] sm:$0xff]  }
  0xb3   :  { %2790 = vmatpush3.bf16.msra.mxu1 %v3079_v23  ;;  %2797 = vmatprep.subr.bf16.mxu0 %v3080_v32  ;;  %v3127_v23 = vld [vmem:[#allocation5 + $0x5a0] sm:$0xff]   ;;  %v3136_v32 = vld [vmem:[#allocation5 + $0x548] sm:$0xff]  }
  0xb4   :  { %2819 = vmatprep.subr.bf16.mxu1 %v3081_v33  ;;  %v3137_v33 = vld [vmem:[#allocation5 + $0x5c8] sm:$0xff]  }
  0xb5   :  { %1945 = vmatmul.mubr.bf16.vlgmr.msra.gmra.mxu0 %v117_v29  ;;  %v3133_v29 = vld [vmem:[#allocation5 + $0x5d0] sm:$0xff]  }
  0xb6   :  { %1985 = vmatmul.mubr.bf16.vlgmr.msra.gmra.mxu1 %v119_v31  ;;  %2798 = vmatpush3.bf16.msra.mxu0 %v3082_v34  ;;  %v3135_v31 = vld [vmem:[#allocation5 + $0x590] sm:$0xff]   ;;  %v3138_v34 = vld [vmem:[#allocation5 + $0x508] sm:$0xff]  }
  0xb7   :  { %2820 = vmatpush3.bf16.msra.mxu1 %v3083_v35  ;;  %2799 = vmatprep.subr.bf16.mxu0 %v3084_v36  ;;  %v3139_v35 = vld [vmem:[#allocation5 + $0x588] sm:$0xff]   ;;  %v3140_v36 = vld [vmem:[#allocation5 + $0x540] sm:$0xff]  }
  0xb8   :  { %2821 = vmatprep.subr.bf16.mxu1 %v3085_v37  ;;  %2024 = vmatprep.mubr.bf16.mxu0 %v122_v2  ;;  %v3141_v37 = vld [vmem:[#allocation5 + $0x5c0] sm:$0xff]   ;;  %v3148_v2 = vld [vmem:[#allocation7 + $0x18] sm:$0xff]  }
  0xb9   :  { %2064 = vmatprep.mubr.bf16.mxu1 %v124_v3 }
  0xba   :  { %2800 = vmatpush3.bf16.msra.mxu0 %v3086_v38  ;;  %v3142_v38 = vld [vmem:[#allocation5 + $0x500] sm:$0xff]  }
  0xbb   :  { %2822 = vmatpush3.bf16.msra.mxu1 %v3087_v39  ;;  %2801 = vmatprep.subr.bf16.mxu0 %v3088_v40  ;;  %v3143_v39 = vld [vmem:[#allocation5 + $0x580] sm:$0xff]   ;;  %v102_v40 = vld [vmem:[#allocation2 + $0xa8] sm:$0xff] }
  0xbc   :  { %2823 = vmatprep.subr.bf16.mxu1 %v3089_v41  ;;  %v126_v41 = vpack.c.bf16 %v102_v40, %v102_v40 }
  0xbe   :  { %2802 = vmatpush3.bf16.msra.mxu0 %v3090_v42  ;;  %v104_v42 = vld [vmem:[#allocation2 + $0xb8] sm:$0xff] }
  0xbf   :  { %2824 = vmatpush3.bf16.msra.mxu1 %v3091_v43  ;;  %2803 = vmatprep.subr.bf16.mxu0 %v3092_v44  ;;  %v101_v43 = vld [vmem:[#allocation2 + $0xa0] sm:$0xff]  ;;  %v103_v44 = vld [vmem:[#allocation2 + $0xb0] sm:$0xff] }
  0xc0   :  { %2825 = vmatprep.subr.bf16.mxu1 %v3093_v45  ;;  %v128_v45 = vpack.c.bf16 %v104_v42, %v104_v42 }
  0xc2   :  { %2804 = vmatpush3.bf16.msra.mxu0 %v3094_v46  ;;  %v125_v46 = vpack.c.bf16 %v101_v43, %v101_v43 }
  0xc3   :  { %2826 = vmatpush3.bf16.msra.mxu1 %v3095_v47  ;;  %2805 = vmatprep.subr.bf16.mxu0 %v3096_v48  ;;  %v127_v47 = vpack.c.bf16 %v103_v44, %v103_v44 }
  0xc4   :  { %2827 = vmatprep.subr.bf16.mxu1 %v3097_v49 }
  0xc6   :  { %2806 = vmatpush3.bf16.msra.mxu0 %v3098_v50  ;;  %v2410_v50 = vld [vmem:[%s3374_s2] ss:$0 sm:$0xff] }
  0xc7   :  { %2828 = vmatpush3.bf16.msra.mxu1 %v3099_v51  ;;  %2807 = vmatprep.subr.bf16.mxu0 %v3100_v52 }
  0xc8   :  { %2829 = vmatprep.subr.bf16.mxu1 %v3101_v53 }
  0xca   :  { %2808 = vmatpush3.bf16.msra.mxu0 %v3102_v54 }
  0xcb   :  { %2830 = vmatpush3.bf16.msra.mxu1 %v3103_v55  ;;  %2809 = vmatprep.subr.bf16.mxu0 %v3104_v56 }
  0xcc   :  { %2831 = vmatprep.subr.bf16.mxu1 %v3105_v57 }
  0xce   :  { %2810 = vmatpush3.bf16.msra.mxu0 %v3106_v58 }
  0xcf   :  { %2832 = vmatpush3.bf16.msra.mxu1 %v3107_v59  ;;  %2811 = vmatprep.subr.bf16.mxu0 %v3108_v60 }
  0xd0   :  { %2833 = vmatprep.subr.bf16.mxu1 %v3109_v61  ;;  %v3144_v61 = vld [vmem:[#allocation7 + $0x38] sm:$0xff]  }
  0xd2   :  { %2812 = vmatpush3.bf16.msra.mxu0 %v3110_v62  ;;  %v3278_v62 = vmov 0.0  }
  0xd3   :  { %2834 = vmatpush3.bf16.msra.mxu1 %v3111_v63  ;;  %2841 = vmatprep.subr.bf16.mxu0 %v3112_v8  ;;  %v3145_v63 = vld [vmem:[#allocation7 + $0x30] sm:$0xff]  }
  0xd4   :  { %2863 = vmatprep.subr.bf16.mxu1 %v3113_v9 }
  0xd5   :  { %2025 = vmatmul.mubr.bf16.vlgmr.msra.gmra.mxu0 %v121_v6 }
  0xd6   :  { %2065 = vmatmul.mubr.bf16.vlgmr.msra.gmra.mxu1 %v123_v7  ;;  %2842 = vmatpush3.bf16.msra.mxu0 %v3114_v10 }
  0xd7   :  { %2864 = vmatpush3.bf16.msra.mxu1 %v3115_v11  ;;  %2843 = vmatprep.subr.bf16.mxu0 %v3116_v12 }
  0xd8   :  { %2865 = vmatprep.subr.bf16.mxu1 %v3117_v13  ;;  %2104 = vmatprep.mubr.bf16.mxu0 %v126_v41  ;;  %v3149_v13 = vld [vmem:[#allocation7 + $0x10] sm:$0xff]  }
  0xd9   :  { %2144 = vmatprep.mubr.bf16.mxu1 %v128_v45 }
  0xda   :  { %2844 = vmatpush3.bf16.msra.mxu0 %v3118_v14 }
  0xdb   :  { %2866 = vmatpush3.bf16.msra.mxu1 %v3119_v15  ;;  %2845 = vmatprep.subr.bf16.mxu0 %v3120_v16  ;;  %v3150_v16 = vld [vmem:[#allocation7 + $0x8] sm:$0xff]  }
  0xdc   :  { %2867 = vmatprep.subr.bf16.mxu1 %v3121_v17  ;;  %v3151_v17 = vld [vmem:[#allocation7] sm:$0xff]  }
  0xde   :  { %2846 = vmatpush3.bf16.msra.mxu0 %v3122_v18  ;;  %v3152_v18 = vld [vmem:[#allocation8 + $0x38] sm:$0xff]  }
  0xdf   :  { %2868 = vmatpush3.bf16.msra.mxu1 %v3123_v19  ;;  %2847 = vmatprep.subr.bf16.mxu0 %v3124_v20  ;;  %v3153_v19 = vld [vmem:[#allocation8 + $0x30] sm:$0xff]   ;;  %v3154_v20 = vld [vmem:[#allocation8 + $0x28] sm:$0xff]  }
  0xe0   :  { %2869 = vmatprep.subr.bf16.mxu1 %v3125_v21  ;;  %v3155_v21 = vld [vmem:[#allocation8 + $0x20] sm:$0xff]  }
  0xe2   :  { %2848 = vmatpush3.bf16.msra.mxu0 %v3126_v22  ;;  %v3156_v22 = vld [vmem:[#allocation8 + $0x18] sm:$0xff]  }
  0xe3   :  { %2870 = vmatpush3.bf16.msra.mxu1 %v3127_v23  ;;  %2849 = vmatprep.subr.bf16.mxu0 %v3128_v24 }
  0xe4   :  { %2871 = vmatprep.subr.bf16.mxu1 %v3129_v25 }
  0xe6   :  { %2850 = vmatpush3.bf16.msra.mxu0 %v3130_v26 }
  0xe7   :  { %2872 = vmatpush3.bf16.msra.mxu1 %v3131_v27  ;;  %2851 = vmatprep.subr.bf16.mxu0 %v3132_v28  ;;  %v3157_v28 = vld [vmem:[#allocation8 + $0x10] sm:$0xff]  }
  0xe8   :  { %2873 = vmatprep.subr.bf16.mxu1 %v3133_v29 }
  0xea   :  { %2852 = vmatpush3.bf16.msra.mxu0 %v3134_v30 }
  0xeb   :  { %2874 = vmatpush3.bf16.msra.mxu1 %v3135_v31  ;;  %2853 = vmatprep.subr.bf16.mxu0 %v3136_v32 }
  0xec   :  { %2875 = vmatprep.subr.bf16.mxu1 %v3137_v33 }
  0xee   :  { %2854 = vmatpush3.bf16.msra.mxu0 %v3138_v34 }
  0xef   :  { %2876 = vmatpush3.bf16.msra.mxu1 %v3139_v35  ;;  %2855 = vmatprep.subr.bf16.mxu0 %v3140_v36 }
  0xf0   :  { %2877 = vmatprep.subr.bf16.mxu1 %v3141_v37 }
  0xf2   :  { %2856 = vmatpush3.bf16.msra.mxu0 %v3142_v38 }
  0xf3   :  { %2878 = vmatpush3.bf16.msra.mxu1 %v3143_v39  ;;  %2903 = vmatprep.subr.bf16.mxu0 %v3278_v62 }
  0xf4   :  { %2923 = vmatprep.subr.bf16.mxu1 %v3278_v62 }
  0xf5   :  { %2105 = vmatmul.mubr.bf16.vlgmr.msra.gmra.mxu0 %v125_v46 }
  0xf6   :  { %2145 = vmatmul.mubr.bf16.vlgmr.msra.gmra.mxu1 %v127_v47  ;;  %2904 = vmatpush3.bf16.msra.mxu0 %v3144_v61 }
  0xf7   :  { %2905 = vmatprep.subr.bf16.mxu0 %v3278_v62  ;;  %2919 = vmatprep.mubr.msk.bf16.mxu0 %vm3279_vm0, %v3278_v62 }
  0xf8   :  { %2939 = vmatprep.mubr.msk.bf16.mxu1 %vm3279_vm0, %v3278_v62  ;;  %2924 = vmatpush3.bf16.msra.mxu1 %v3152_v18 }
  0xf9   :  { %2925 = vmatprep.subr.bf16.mxu1 %v3278_v62 }
  0xfa   :  { %2906 = vmatpush3.bf16.msra.mxu0 %v3145_v63 }
  0xfb   :  { %2907 = vmatprep.subr.bf16.mxu0 %v3278_v62 }
  0xfc   :  { %2926 = vmatpush3.bf16.msra.mxu1 %v3153_v19 }
  0xfd   :  { %2927 = vmatprep.subr.bf16.mxu1 %v3278_v62 }
  0xfe   :  { %2908 = vmatpush3.bf16.msra.mxu0 %v3146_v0 }
  0xff   :  { %2909 = vmatprep.subr.bf16.mxu0 %v3278_v62 }
 0x100   :  { %2928 = vmatpush3.bf16.msra.mxu1 %v3154_v20 }
 0x101   :  { %2929 = vmatprep.subr.bf16.mxu1 %v3278_v62 }
 0x102   :  { %2910 = vmatpush3.bf16.msra.mxu0 %v3147_v1 }
 0x103   :  { %2911 = vmatprep.subr.bf16.mxu0 %v3278_v62 }
 0x104   :  { %2930 = vmatpush3.bf16.msra.mxu1 %v3155_v21  ;;  %v2612_v21 = vld [vmem:[%s3378_s6] ss:$0 sm:$0xff] }
 0x105   :  { %2931 = vmatprep.subr.bf16.mxu1 %v3278_v62 }
 0x106   :  { %2912 = vmatpush3.bf16.msra.mxu0 %v3148_v2 }
 0x107   :  { %2913 = vmatprep.subr.bf16.mxu0 %v3278_v62 }
 0x108   :  { %2932 = vmatpush3.bf16.msra.mxu1 %v3156_v22 }
 0x109   :  { %2933 = vmatprep.subr.bf16.mxu1 %v3278_v62 }
 0x10a   :  { %2914 = vmatpush3.bf16.msra.mxu0 %v3149_v13  ;;  %v2603_v13 = vld [vmem:[%s3376_s4] ss:$0 sm:$0xff]  ;;  %s3280_s4 = smov [#allocation10]  }
 0x10b   :  { %2915 = vmatprep.subr.bf16.mxu0 %v3278_v62  ;;  %s2399_s6 = sshll.u32 %s3280_s4, 4  ;;  %s2400_s6 = int_to_ptr.vmem [resolvable:$true] %s2399_s6 }
 0x10c   :  { %2934 = vmatpush3.bf16.msra.mxu1 %v3157_v28  ;;  %s3244_s24 = scalar_lea.vmem %s2400_s6, 128  ;;  %p3249_p7 = scmp.lt.s32.totalorder %s2400_s6, %s2400_s6 }
 0x10d   :  { %2935 = vmatprep.subr.bf16.mxu1 %v3278_v62  ;;  %p3245_p6 = scmp.ne.s32.totalorder %s2400_s6, %s3244_s24  ;;  %p3250_p8 = scmp.lt.s32.totalorder %s3244_s24, %s3244_s24 }
 0x10e   :  { %2916 = vmatpush3.bf16.msra.mxu0 %v3150_v16 }
 0x10f   :  { %2917 = vmatprep.subr.bf16.mxu0 %v3278_v62  ;;  %p3251_p9 = por %p3250_p8, %p3249_p7 }
 0x111   :  { %p3252_p10 = pnand %p3251_p9, %p3245_p6 }
 0x112   :  { %2918 = vmatpush3.bf16.msra.mxu0 %v3151_v17 }
 0x115   :  { %v2637_v48 = vpop.f32.mrf.mxu0 }
 0x116   :  { %v2659_v49 = vpop.f32.mrf.mxu1 }
 0x117   :  { %v2638_v51 = vpop.f32.mrf.mxu0 }
 0x118   :  { %v2660_v52 = vpop.f32.mrf.mxu1  ;;  %v2639_v53 = vadd.f32 %v2638_v51, %v2637_v48 }
 0x119   :  { %v2661_v54 = vadd.f32 %v2660_v52, %v2659_v49  ;;  %v2640_v55 = vpop.f32.mrf.mxu0 }
 0x11a   :  { %v2662_v56 = vpop.f32.mrf.mxu1  ;;  %v1707_v57 = vadd.f32 %v2639_v53, %v2410_v50 }
 0x11b   :  { %v2641_v58 = vpop.f32.mrf.mxu0 }
 0x11c   :  { %v2663_v59 = vpop.f32.mrf.mxu1  ;;  %v1747_v60 = vadd.f32 %v2661_v54, %v1707_v57 }
 0x135   :  { %v2681_v3 = vpop.f32.mrf.mxu0 }
 0x136   :  { %v2703_v4 = vpop.f32.mrf.mxu1 }
 0x137   :  { %v2682_v5 = vpop.f32.mrf.mxu0 }
 0x138   :  { %v2683_v6 = vadd.f32 %v2682_v5, %v2681_v3  ;;  %v2704_v7 = vpop.f32.mrf.mxu1 }
 0x139   :  { %v2705_v8 = vadd.f32 %v2704_v7, %v2703_v4  ;;  %v2684_v9 = vpop.f32.mrf.mxu0 }
 0x13a   :  { %v1787_v10 = vadd.f32 %v2683_v6, %v1747_v60  ;;  %v2706_v11 = vpop.f32.mrf.mxu1 }
 0x13b   :  { %v2685_v12 = vpop.f32.mrf.mxu0  ;;  %v3158_v11 = vld [vmem:[#allocation8 + $0x8] sm:$0xff]  }
 0x13c   :  { %v1827_v14 = vadd.f32 %v2705_v8, %v1787_v10  ;;  %v2707_v15 = vpop.f32.mrf.mxu1  ;;  %2936 = vmatpush3.bf16.msra.mxu1 %v3158_v11  ;;  %v3159_v12 = vld [vmem:[#allocation8] sm:$0xff]  }
 0x13d   :  { %2937 = vmatprep.subr.bf16.mxu1 %v3278_v62 }
 0x140   :  { %2938 = vmatpush3.bf16.msra.mxu1 %v3159_v12 }
 0x155   :  { %v2725_v23 = vpop.f32.mrf.mxu0 }
 0x156   :  { %v2747_v24 = vpop.f32.mrf.mxu1 }
 0x157   :  { %v2726_v25 = vpop.f32.mrf.mxu0 }
 0x158   :  { %v2727_v26 = vadd.f32 %v2726_v25, %v2725_v23  ;;  %v2748_v27 = vpop.f32.mrf.mxu1 }
 0x159   :  { %v2749_v29 = vadd.f32 %v2748_v27, %v2747_v24  ;;  %v2728_v30 = vpop.f32.mrf.mxu0 }
 0x15a   :  { %v1867_v31 = vadd.f32 %v2727_v26, %v1827_v14  ;;  %v2750_v32 = vpop.f32.mrf.mxu1 }
 0x15b   :  { %v2729_v33 = vpop.f32.mrf.mxu0 }
 0x15c   :  { %v1907_v34 = vadd.f32 %v2749_v29, %v1867_v31  ;;  %v2751_v35 = vpop.f32.mrf.mxu1  ;;  %v2381_v29 = vlaneseq }
 0x15e   :  { %v2382_v30 = vand.u32 127, %v2381_v29 }
 0x160   :  { %vm2383_vm1 = vcmp.lt.s32.totalorder %v2382_v30, 10 }
 0x175   :  { %v2769_v36 = vpop.f32.mrf.mxu0 }
 0x176   :  { %v2791_v37 = vpop.f32.mrf.mxu1 }
 0x177   :  { %v2770_v38 = vpop.f32.mrf.mxu0 }
 0x178   :  { %v2792_v39 = vpop.f32.mrf.mxu1  ;;  %v2771_v52 = vadd.f32 %v2770_v38, %v2769_v36 }
 0x179   :  { %v2772_v40 = vpop.f32.mrf.mxu0  ;;  %v2793_v54 = vadd.f32 %v2792_v39, %v2791_v37 }
 0x17a   :  { %v2794_v41 = vpop.f32.mrf.mxu1  ;;  %v1947_v53 = vadd.f32 %v2771_v52, %v1907_v34 }
 0x17b   :  { %v2773_v42 = vpop.f32.mrf.mxu0 }
 0x17c   :  { %v2795_v43 = vpop.f32.mrf.mxu1  ;;  %v1987_v56 = vadd.f32 %v2793_v54, %v1947_v53 }
 0x195   :  { %v2813_v44 = vpop.f32.mrf.mxu0 }
 0x196   :  { %v2835_v45 = vpop.f32.mrf.mxu1 }
 0x197   :  { %v2814_v46 = vpop.f32.mrf.mxu0 }
 0x198   :  { %v2836_v47 = vpop.f32.mrf.mxu1  ;;  %v2815_v55 = vadd.f32 %v2814_v46, %v2813_v44 }
 0x199   :  { %v2816_v48 = vpop.f32.mrf.mxu0  ;;  %v2837_v58 = vadd.f32 %v2836_v47, %v2835_v45 }
 0x19a   :  { %v2838_v49 = vpop.f32.mrf.mxu1  ;;  %v2027_v57 = vadd.f32 %v2815_v55, %v1987_v56 }
 0x19b   :  { %v2817_v50 = vpop.f32.mrf.mxu0 }
 0x19c   :  { %v2839_v51 = vpop.f32.mrf.mxu1  ;;  %v2067_v63 = vadd.f32 %v2837_v58, %v2027_v57 }
 0x1b5   :  { %v2857_v59 = vpop.f32.mrf.mxu0 }
 0x1b6   :  { %v2879_v60 = vpop.f32.mrf.mxu1 }
 0x1b7   :  { %v2858_v61 = vpop.f32.mrf.mxu0 }
 0x1b8   :  { %v2859_v0 = vadd.f32 %v2858_v61, %v2857_v59  ;;  %v2880_v1 = vpop.f32.mrf.mxu1 }
 0x1b9   :  { %v2860_v2 = vpop.f32.mrf.mxu0  ;;  %v2881_v4 = vadd.f32 %v2880_v1, %v2879_v60 }
 0x1ba   :  { %v2107_v3 = vadd.f32 %v2859_v0, %v2067_v63  ;;  %v2882_v5 = vpop.f32.mrf.mxu1 }
 0x1bb   :  { %v2861_v6 = vpop.f32.mrf.mxu0 }
 0x1bc   :  { %v2147_v7 = vadd.f32 %v2881_v4, %v2107_v3  ;;  %v2883_v8 = vpop.f32.mrf.mxu1 }
 0x1be   :  { %v2152_v9 = vmax.f32 %v2147_v7, 0.0 }
 0x1c0   :  { %v2153_v10 = vpack.c.bf16 %v2152_v9, %v2152_v9 }
 0x1c2   :  { %2920 = vmatmul.mubr.bf16.vlgmr.msra.gmra.mxu0 %v2153_v10 }
 0x282   :  { %v2259_v14 = vpop.f32.mrf.mxu0 }
 0x283   :  { %v2260_v15 = vadd.f32 %v2603_v13, %v2259_v14 }
 0x284   :  { %v2921_v16 = vpop.f32.mrf.mxu0 }
 0x285   :  { %v2265_v17 = vmax.f32 %v2260_v15, 0.0 }
 0x286   :  { %v2262_v18 = vpop.f32.mrf.mxu0 }
 0x287   :  { %v2266_v19 = vpack.c.bf16 %v2265_v17, %v2265_v17 }
 0x288   :  { %v2922_v20 = vpop.f32.mrf.mxu0 }
 0x289   :  { %2940 = vmatmul.mubr.bf16.vlgmr.msra.gmra.mxu1 %v2266_v19 }
 0x349   :  { %v2372_v22 = vpop.f32.mrf.mxu1 }
 0x34a   :  { %v2373_v62 = vadd.f32 %v2612_v21, %v2372_v22 }
 0x34b   :  { %v2941_v23 = vpop.f32.mrf.mxu1 }
 0x34c   :  { %2378 = vmax.xlane.f32.xlu0 %v2373_v62 }
 0x34d   :  { %v2375_v24 = vpop.f32.mrf.mxu1 }
 0x34f   :  { %v2942_v25 = vpop.f32.mrf.mxu1 }
 0x3d5   :  { %v2379_v26 = vpop.xlane.xlu0 %2378 }
 0x3d6   :  { %v2380_v27 = vsub.f32 %v2373_v62, %v2379_v26 }
 0x3d8   :  { %v2384_v28 = vmul.f32 1.442695, %v2380_v27 }
 0x3da   :  { %3160 = vpow2.f32 %v2384_v28 }
 0x3e7   :  { %v3161_v31 = vpop.eup %3160 }
 0x3e8   :  { %v2386_v32 = vsel %vm2383_vm1, %v3161_v31, 0.0 }
 0x3e9   :  { %2387 = vadd.xlane.f32.xlu0 %v2386_v32 }
 0x472   :  { %v2388_v33 = vpop.xlane.xlu0 %2387 }
 0x473   :  { %3162 = vlog2.f32 %v2388_v33 }
 0x480   :  { %v3163_v34 = vpop.eup %3162 }
 0x481   :  { %v2390_v35 = vmul.f32 0.6931472, %v3163_v34 }
 0x483   :  { %v2391_v36 = vsub.f32 %v2380_v27, %v2390_v35 }
 0x485   :  { %2392 = vst [vmem:[#allocation10] sm:$0xff] %v2391_v36 }
 0x486   :  { %3255 = shalt.err (!%p3252_p10)
}
 0x487   :  { %2402 = dma.vmem_to_hbm [thread:$0]  %s2400_s6, 128, %s3379_s7, [#allocation4]  }
 0x488   :  { %3270 = dma.done.wait [#allocation4], 128  }
 0x489   :  { %3271 = vsyncadd [#allocation4], 4294967168 }
 0x48a   :  { %2406 = vsyncpa [#allocation3], 1 }
 0x48b   :  { %2407 = vsyncpa [#allocation6], 1 }
 0x48c   :  { %2408 = vsyncpa [#allocation9], 1 }
 0x48d   :  { %2409 = vsyncpa [#allocation4], 1 }

</bundles_post_ra>
